<compile_context>
chip_gen: v5e
topology: v5e:2x2
jax: 0.10.0
libtpu: 0.0.40
codegen_flags: <defaults>
</compile_context>

<pallas_src>
import jax
import jax.numpy as jnp
from jax.experimental import pallas as pl
from jax.experimental.pallas import tpu as pltpu


def _round_up(v, m):
    return -(-v // m) * m


def _patch_embed_kernel(patches_ref, w_ref, pos_ref, out_ref):
    # patches_ref: (TM, K_pad)      bf16  per-(batch, row-tile) patch matrix
    # w_ref:       (K_pad, E_pad)   bf16  resident conv weight (reshaped + transposed)
    # pos_ref:     (Np_pad, E_pad)  f32   resident pos table (conv bias + cls folded in)
    # out_ref:     (TM, E_pad)      f32
    tm = patches_ref.shape[0]
    i = pl.program_id(1)
    row0 = pl.multiple_of(i * tm, tm)
    acc = jnp.dot(patches_ref[...], w_ref[...],
                  preferred_element_type=jnp.float32)          # MXU, f32 accumulate
    out_ref[...] = acc + pos_ref[pl.ds(row0, tm), :]           # f32 epilogue


def patch_embedding(x, conv_w, conv_b, cls_token, pos_embed, patch_size):
    """x: (B, C, H, W) float32, NCHW like the PyTorch module.

    Returns (B, num_patches + 1, embed_dim) float32 with the cls token appended
    AFTER the patch tokens (matching torch.cat([x, cls_token], dim=1)).
    """
    B, C, H, W = x.shape
    P = patch_size
    E = conv_w.shape[0]
    assert H % P == 0 and W % P == 0, "H/W must be divisible by patch_size"
    nH, nW = H // P, W // P
    N = nH * nW
    K = C * P * P
    Np = N + 1                      # patch tokens + fused cls row

    # ---- tile sizes --------------------------------------------------------
    # TM=256 matches the v6e/v7x 256-wide MXU; small configs round to the bf16
    # sublane-pack multiple (16). Output last dim is the full (128-aligned) E.
    TM = 256 if Np >= 256 else _round_up(Np, 16)
    Np_pad = _round_up(Np, TM)
    K_pad = _round_up(K, 128)
    E_pad = _round_up(E, 128)

    # ---- host-side glue ----------------------------------------------------
    # Exact equivalent of Conv2d(kernel=P, stride=P) patch extraction; feature
    # order (c, kh, kw) matches PyTorch's Conv2d weight layout. Cast to bf16
    # BEFORE the transpose so the copy moves half the bytes.
    xb = x.astype(jnp.bfloat16)
    patches = xb.reshape(B, C, nH, P, nW, P).transpose(0, 2, 4, 1, 3, 5).reshape(B, N, K)
    # Rows N..Np_pad-1 are zero; zero row N makes out[N] == cls + pos[N] below.
    patches = jnp.pad(patches, ((0, 0), (0, Np_pad - N), (0, K_pad - K)))

    # conv weight (E, C, P, P) -> (K, E) so that patches @ w == conv output.
    w = conv_w.reshape(E, K).T.astype(jnp.bfloat16)
    w = jnp.pad(w, ((0, K_pad - K), (0, E_pad - E)))

    # Position table with the conv bias folded into the patch rows and the cls
    # token folded into row N (no conv bias there: that row's matmul input is 0).
    pos = pos_embed.reshape(Np, E).astype(jnp.float32)
    pos_tok = pos[:N] + conv_b[None, :].astype(jnp.float32)
    pos_cls = pos[N:N + 1] + cls_token.reshape(1, E).astype(jnp.float32)
    pos_b = jnp.pad(jnp.concatenate([pos_tok, pos_cls], axis=0),
                    ((0, Np_pad - Np), (0, E_pad - E)))

    grid = (B, Np_pad // TM)

    # ---- explicit VMEM budget (resident weight + pos, double-buffered tiles) ---
    resident = K_pad * E_pad * 2 + Np_pad * E_pad * 4
    per_step = TM * K_pad * 2 + TM * E_pad * 4
    vmem_need = resident + 2 * per_step
    vmem_limit = int(min(96 * 2**20, max(2 * vmem_need, 32 * 2**20)))

    out_pad = pl.pallas_call(
        _patch_embed_kernel,
        out_shape=jax.ShapeDtypeStruct((B, Np_pad, E_pad), jnp.float32),
        grid_spec=pltpu.PrefetchScalarGridSpec(
            num_scalar_prefetch=0,
            grid=grid,
            in_specs=[
                # per-step patch row tile (leading batch dim squeezed out)
                pl.BlockSpec((None, TM, K_pad), lambda b, i: (b, i, 0)),
                # resident weight: constant block index -> DMA'd once
                pl.BlockSpec((K_pad, E_pad), lambda b, i: (0, 0)),
                # resident pos table: constant block index -> DMA'd once
                pl.BlockSpec((Np_pad, E_pad), lambda b, i: (0, 0)),
            ],
            out_specs=pl.BlockSpec((None, TM, E_pad), lambda b, i: (b, i, 0)),
        ),
        compiler_params=pltpu.CompilerParams(
            dimension_semantics=("parallel", "parallel"),
            vmem_limit_bytes=vmem_limit,
        ),
    )(patches, w, pos_b)

    # Strip padding; cls row is already fused at position N.
    return out_pad[:, :Np, :E]


def _reference(x, conv_w, conv_b, cls_token, pos_embed, patch_size):
    """Plain-JAX reference mirroring the PyTorch forward (dropout in eval).

    Uses the same bf16 operand precision (f32 accumulate) as the kernel.
    """
    B, C, H, W = x.shape
    P = patch_size
    E = conv_w.shape[0]
    nH, nW = H // P, W // P
    N = nH * nW
    patches = x.reshape(B, C, nH, P, nW, P).transpose(0, 2, 4, 1, 3, 5).reshape(B, N, C * P * P)
    emb = jnp.dot(patches.astype(jnp.bfloat16),
                  conv_w.reshape(E, -1).T.astype(jnp.bfloat16),
                  preferred_element_type=jnp.float32)
    emb = emb + conv_b[None, None, :]
    cls = jnp.broadcast_to(cls_token.reshape(1, 1, E), (B, 1, E))
    return jnp.concatenate([emb, cls], axis=1) + pos_embed.reshape(1, N + 1, E)


if __name__ == "__main__":
    # Small, module-consistent shapes: embed_dim == patch_size*patch_size*in_channels
    B, C, H, W = 2, 4, 16, 16
    P = 4
    E = C * P * P              # 64
    N = (H // P) * (W // P)    # 16

    key = jax.random.PRNGKey(0)
    kx, kw, kb, kc, kp = jax.random.split(key, 5)
    x = jax.random.normal(kx, (B, C, H, W), dtype=jnp.float32)
    conv_w = jax.random.normal(kw, (E, C, P, P), dtype=jnp.float32) * 0.02
    conv_b = jax.random.normal(kb, (E,), dtype=jnp.float32) * 0.02
    cls_token = jax.random.normal(kc, (1, 1, E), dtype=jnp.float32)
    pos_embed = jax.random.normal(kp, (1, N + 1, E), dtype=jnp.float32)

    out = patch_embedding(x, conv_w, conv_b, cls_token, pos_embed, P)
    out = jax.block_until_ready(out)

    ref = _reference(x, conv_w, conv_b, cls_token, pos_embed, P)
    assert out.shape == (B, N + 1, E)
    assert jnp.allclose(out, ref, atol=1e-3, rtol=1e-3), float(jnp.max(jnp.abs(out - ref)))
    print("KERNEL_OK")
</pallas_src>

<mosaic_0001>
module attributes {stable_mosaic.version = 11 : i64} {
  func.func @_patch_embed_kernel(%arg0: i32, %arg1: i32, %arg2: memref<1x32x128xbf16, #tpu.memory_space<vmem>>, %arg3: memref<128x128xbf16, #tpu.memory_space<vmem>>, %arg4: memref<32x128xf32, #tpu.memory_space<vmem>>, %arg5: memref<1x32x128xf32, #tpu.memory_space<vmem>>) attributes {dimension_semantics = [#tpu.dimension_semantics<parallel>, #tpu.dimension_semantics<parallel>], iteration_bounds = array<i64: 2, 1>, scalar_prefetch = 0 : i64, scratch_operands = 0 : i64, tpu.core_type = #tpu.core_type<tc>, window_params = [{transform_indices = @transform_0, window_bounds = array<i64: 1, 32, 128>}, {pipeline_mode = #tpu.pipeline_mode<synchronous>, transform_indices = @transform_1, window_bounds = array<i64: 128, 128>}, {pipeline_mode = #tpu.pipeline_mode<synchronous>, transform_indices = @transform_2, window_bounds = array<i64: 32, 128>}, {transform_indices = @transform_3, window_bounds = array<i64: 1, 32, 128>}]} {
    %c32_i32 = arith.constant 32 : i32
    %0 = arith.muli %arg1, %c32_i32 : i32
    %1 = tpu.assume_multiple %0, 32 : i32
    %c0 = arith.constant 0 : index
    %c0_0 = arith.constant 0 : index
    %c0_1 = arith.constant 0 : index
    %2 = vector.load %arg2[%c0, %c0_0, %c0_1] : memref<1x32x128xbf16, #tpu.memory_space<vmem>>, vector<1x32x128xbf16>
    %3 = vector.shape_cast %2 : vector<1x32x128xbf16> to vector<32x128xbf16>
    %c0_2 = arith.constant 0 : index
    %c0_3 = arith.constant 0 : index
    %4 = vector.load %arg3[%c0_2, %c0_3] : memref<128x128xbf16, #tpu.memory_space<vmem>>, vector<128x128xbf16>
    %cst = arith.constant dense<0.000000e+00> : vector<32x128xf32>
    %5 = tpu.matmul %3, %4, %cst {dimension_numbers = #tpu.dot_dimension_numbers<[1], [0], [0], [1], [0, 0, 1, 1], [], []>} : vector<32x128xbf16>, vector<128x128xbf16>, vector<32x128xf32> -> vector<32x128xf32>
    %6 = arith.index_cast %1 : i32 to index
    %c0_4 = arith.constant 0 : index
    %7 = vector.load %arg4[%6, %c0_4] : memref<32x128xf32, #tpu.memory_space<vmem>>, vector<32x128xf32>
    %8 = arith.addf %5, %7 : vector<32x128xf32>
    %c0_5 = arith.constant 0 : index
    %c0_6 = arith.constant 0 : index
    %c0_7 = arith.constant 0 : index
    %9 = vector.load %arg5[%c0_5, %c0_6, %c0_7] : memref<1x32x128xf32, #tpu.memory_space<vmem>>, vector<1x32x128xf32>
    %10 = vector.shape_cast %9 : vector<1x32x128xf32> to vector<32x128xf32>
    %11 = vector.shape_cast %8 : vector<32x128xf32> to vector<1x32x128xf32>
    tpu.vector_store %arg5[%c0_5, %c0_6, %c0_7], %11 {strides = array<i32>} : memref<1x32x128xf32, #tpu.memory_space<vmem>>, vector<1x32x128xf32>,
    return
  }
  func.func @transform_0(%arg0: i32, %arg1: i32) -> (i32, i32, i32) {
    %c0_i32 = arith.constant 0 : i32
    %c0_i32_0 = arith.constant 0 : i32
    return %arg0, %arg1, %c0_i32 : i32, i32, i32
  }
  func.func @transform_1(%arg0: i32, %arg1: i32) -> (i32, i32) {
    %c0_i32 = arith.constant 0 : i32
    %c0_i32_0 = arith.constant 0 : i32
    %c0_i32_1 = arith.constant 0 : i32
    return %c0_i32, %c0_i32_0 : i32, i32
  }
  func.func @transform_2(%arg0: i32, %arg1: i32) -> (i32, i32) {
    %c0_i32 = arith.constant 0 : i32
    %c0_i32_0 = arith.constant 0 : i32
    %c0_i32_1 = arith.constant 0 : i32
    return %c0_i32, %c0_i32_0 : i32, i32
  }
  func.func @transform_3(%arg0: i32, %arg1: i32) -> (i32, i32, i32) {
    %c0_i32 = arith.constant 0 : i32
    %c0_i32_0 = arith.constant 0 : i32
    return %arg0, %arg1, %c0_i32 : i32, i32, i32
  }
}

</mosaic_0001>

<bundles_post_ra>
// kernel: tpu_custom_call.1
= control target key start
LH: loop header
LB: loop body
LE: loop exit
PB: predicated region body
PF: predicated region fallthrough
CT: control target
= control target key end

     0   :  { %8 = vsyncpa [#allocation3], 0  ;;  %s1006_s0 = inlined_call_operand.hbm [shape: bf16[2,32,128], index: 0, kind: input, shape index: {}]   ;;  %s1007_s1 = inlined_call_operand.hbm [shape: bf16[128,128], index: 1, kind: input, shape index: {}]   ;;  %s1008_s2 = inlined_call_operand.hbm [shape: f32[32,128], index: 2, kind: input, shape index: {}]   ;;  %s1009_s3 = inlined_call_operand.hbm [shape: f32[2,32,128], index: 3, kind: output, shape index: {}]  }
   0x1   :  { %10 = vsyncpa [#allocation3 + $0x1], 0 }
   0x2   :  { %11 = vsyncpa [#allocation6], 0 }
   0x3   :  { %12 = vsyncpa [#allocation4], 0 }
   0x4   :  { %14 = vsyncpa [#allocation4 + $0x1], 0  ;;  %s853_s12 = smov 0   ;;  %s855_s13 = smov 0  }
   0x5   :  { %s857_s14 = smov 0   ;;  %s859_s15 = smov 0  }
   0x6   :  { %s861_s16 = smov 0   ;;  %s863_s17 = smov 0  }
   0x7 LB: > { %s479_s18 = sadd.s32 4294967295, %s823_s17   ;;  %s480_s19 = sadd.s32 4294967294, %s823_s17   ;;  %s823_s17 = sphi %s863_s17, %s20_s17   ;;  %s819_s16 = sphi %s861_s16, %s1019_s16   ;;  %s815_s15 = sphi %s859_s15, %s1018_s15   ;;  %s811_s14 = sphi %s857_s14, %s1017_s14   ;;  %s807_s13 = sphi %s855_s13, %s1016_s13   ;;  %s803_s12 = sphi %s853_s12, %s1015_s12  }
   0x8   : > { %p54_p0 = scmp.ne.s32.totalorder %s807_s13, %s803_s12  ;;  %p889_p1 = scmp.eq.s32.totalorder %s479_s18, 0 }
   0x9   : > { %p128_p2 = scmp.eq.s32.totalorder %s480_s19, 1  ;;  %p481_p4 = scmp.ge.s32.totalorder %s823_s17, 1 }
   0xa   : > { %p895_p3 = por %p889_p1, %p54_p0  ;;  %p135_p6 = scmp.lt.s32.totalorder %s823_s17, 3 }
   0xb   : > { %p900_p5 = por %p128_p2, %p54_p0  ;;  %s146_s25 = sshll.u32 %s1007_s1, 4  ;;  %s147_s25 = int_to_ptr.hbm [resolvable:$true] %s146_s25 }
   0xc   : > { %p908_p7 = pnand %p481_p4, %p135_p6  ;;  %s825_s27 = smov [#allocation5]  }
   0xd   : > { %s148_s28 = sshll.u32 %s825_s27, 4  ;;  %p484_p10 = scmp.ge.s32.totalorder %s823_s17, 2  ;;  %s149_s28 = int_to_ptr.vmem [resolvable:$true] %s148_s28 }
   0xe   : > { %p570_p8 = pneg %p908_p7  ;;  %s160_s4 = sshll.u32 %s1008_s2, 4  ;;  %s161_s4 = int_to_ptr.hbm [resolvable:$true] %s160_s4 }
   0xf   : > { %s826_s5 = smov 64   ;;  %s827_s6 = smov 4  }
  0x10   : > { %p571_p9 = pnand %p570_p8, %p889_p1  ;;  %s828_s7 = smov [#allocation7]  }
  0x11   : > { %s162_s8 = sshll.u32 %s828_s7, 4  ;;  %s829_s9 = smov 128   ;;  %s163_s8 = int_to_ptr.vmem [resolvable:$true] %s162_s8 }
  0x12   : > { %573 = dma.hbm_to_vmem [thread:$0]  (!%p571_p9), %s147_s25, 1024, %s149_s28, [#allocation6], %s826_s5, %s826_s5, %s827_s6  }
  0x13   : > { %s830_s10 = smov 8   ;;  %p122_p11 = scmp.eq.s32.totalorder %s479_s18, 1 }
  0x14   : > { %576 = dma.hbm_to_vmem [thread:$0]  (!%p571_p9), %s161_s4, 512, %s163_s8, [#allocation6], %s829_s9, %s829_s9, %s830_s10  }
  0x15   : > { %s32_s11 = sadd.s32 1, %s819_s16  ;;  %s41_s19 = sadd.s32 1, %s811_s14 }
  0x16   : > { %p34_p12 = scmp.ge.s32.totalorder %s32_s11, 2  ;;  %p48_p13 = scmp.ne.s32.totalorder %s811_s14, %s807_s13 }
  0x17   : > { %p49_p0 = scmp.eq.s32.totalorder %s823_s17, 0  ;;  %p587_p4 = scmp.lt.s32.totalorder %s823_s17, 2 }
  0x18   : > { %s1021_s11 = smov (%p34_p12, %s32_s11), 0  ;;  %p932_p2 = por %p122_p11, %p48_p13 }
  0x19   : > { %s36_s24 = ssub.s32 %s819_s16, %s1021_s11  ;;  %s176_s25 = sand.u32 1, %s811_s14  }
  0x1a   : > { %p39_p6 = scmp.eq.s32.totalorder %s36_s24, 0  ;;  %p50_p8 = por %p49_p0, %p48_p13 }
  0x1b   : > { %s485_s27 = sshll.u32 %s176_s25, 4  ;;  %s538_s18 = sshll.u32 %s819_s16, 4 }
  0x1c   : > { %s942_s28 = scalar_select %p39_p6, %s811_s14, %s41_s19  }
  0x1d   : > { %s187_s4 = scalar_lea.hbm %s1006_s0, %s538_s18  ;;  %s180_s8 = scalar_lea.vmem [#allocation2], %s485_s27 }
  0x1e   : > { %s188_s7 = sshll.u32 %s187_s4, 4  ;;  %s190_s9 = sshll.u32 %s180_s8, 4  ;;  %s189_s7 = int_to_ptr.hbm [resolvable:$true] %s188_s7  ;;  %s191_s9 = int_to_ptr.vmem [resolvable:$true] %s190_s9 }
  0x1f   : > { %p578_p9 = pnand %p587_p4, %p50_p8  ;;  %s177_s10 = scalar_lea.sflag [#allocation3], %s176_s25 }
  0x20   : > { %202 = sbr.rel (%p908_p7) target bundleno = 213 (0xd5), region = 32  ;;  %s955_s19 = sand.u32 (!%p908_p7), 1, %s807_s13  }
  0x21   : > { %580 = dma.hbm_to_vmem [thread:$0]  (!%p578_p9), %s189_s7, 256, %s191_s9, %s177_s10, %s826_s5, %s826_s5, %s827_s6  }
  0x22   : > { %s489_s24 = sshll.u32 (!%p908_p7), %s955_s19, 4  ;;  %s205_s27 = scalar_lea.sflag (!%p908_p7), [#allocation3], %s955_s19 }
  0x23   : > { %s208_s18 = scalar_lea.vmem (!%p908_p7), [#allocation2], %s489_s24 }
  0x25   : > { %790 = dma.done.wait (%p895_p3), %s205_s27, 256  }
  0x26   : > { %792 = vsyncadd (%p895_p3), %s205_s27, 4294967040 }
  0x27   : > { %794 = dma.done.wait (%p889_p1), [#allocation6], 1536  }
  0x28   : > { %796 = vsyncadd (%p889_p1), [#allocation6], 4294965760  ;;  %v548_v0 = vld [vmem:[#allocation5 + $0x38] sm:$0xff]  ;;  %v547_v1 = vld [vmem:[#allocation5 + $0x30] sm:$0xff]  ;;  %s492_s20 = sshll.u32 %s955_s19, 5  ;;  %s549_s21 = sshll.u32 %s815_s15, 5 }
  0x29   : > { %330 = vmatpush.bf16.msra.mxu0 %v548_v0  ;;  %550 = vmatpush.bf16.msra.mxu1 %v548_v0  ;;  %v546_v2 = vld [vmem:[#allocation5 + $0x28] sm:$0xff]  ;;  %v545_v3 = vld [vmem:[#allocation5 + $0x20] sm:$0xff]  ;;  %v544_v4 = vld [vmem:[#allocation5 + $0x18] sm:$0xff]  ;;  %s241_s26 = scalar_lea.vmem [#allocation8], %s492_s20  ;;  %s367_s25 = scalar_lea.hbm %s1009_s3, %s549_s21 }
  0x2a   : > { %v543_v5 = vld [vmem:[#allocation5 + $0x10] sm:$0xff]  ;;  %v542_v6 = vld [vmem:[#allocation5 + $0x8] sm:$0xff]  ;;  %v541_v7 = vld [vmem:[#allocation5] sm:$0xff]  ;;  %s368_s29 = sshll.u32 %s241_s26, 4  ;;  %s370_s30 = sshll.u32 %s367_s25, 4  ;;  %s369_s29 = int_to_ptr.vmem [resolvable:$true] %s368_s29  ;;  %s371_s30 = int_to_ptr.hbm [resolvable:$true] %s370_s30 }
  0x2b   : > { %v539_v8 = vld [vmem:[%s208_s18] sm:$0xff]  ;;  %v540_v9 = vld [vmem:[%s208_s18 + $0x8] sm:$0xff]  ;;  %s354_s15 = scalar_lea.sflag [#allocation4], %s955_s19  ;;  %s751_s4 = sshra.s32 %s371_s30, 4  ;;  %s752_s4 = int_to_ptr.hbm [resolvable:$true] %s751_s4 }
  0x2c   : > { %v266_v10 = vld [vmem:[#allocation7] sm:$0xff]  ;;  %v268_v11 = vld [vmem:[#allocation7 + $0x10] sm:$0xff]  ;;  %v267_v16 = vld [vmem:[#allocation7 + $0x8] sm:$0xff]  ;;  %s753_s7 = scalar_lea.hbm %s752_s4, 32  ;;  %s757_s10 = scalar_lea.hbm %s1009_s3, 64 }
  0x2d   : > { %331 = vmatpush.bf16.msra.mxu0 %v547_v1  ;;  %551 = vmatpush.bf16.msra.mxu1 %v547_v1  ;;  %v269_v17 = vld [vmem:[#allocation7 + $0x18] sm:$0xff]  ;;  %p754_p1 = scmp.ne.s32.totalorder %s752_s4, %s753_s7  ;;  %p758_p11 = scmp.lt.s32.totalorder %s752_s4, %s1009_s3 }
  0x2e   : > { %p759_p12 = scmp.lt.s32.totalorder %s757_s10, %s753_s7 }
  0x2f   : > { %p755_p3 = pnand %p754_p1, %p932_p2 }
  0x30   : > { %p760_p13 = por %p759_p12, %p758_p11 }
  0x31   : > { %332 = vmatpush.bf16.msra.mxu0 %v546_v2  ;;  %552 = vmatpush.bf16.msra.mxu1 %v546_v2  ;;  %p756_p7 = pneg %p755_p3 }
  0x33   : > { %p761_p0 = pnand %p760_p13, %p756_p7 }
  0x35   : > { %333 = vmatpush.bf16.msra.mxu0 %v545_v3  ;;  %553 = vmatpush.bf16.msra.mxu1 %v545_v3 }
  0x39   : > { %334 = vmatpush.bf16.msra.mxu0 %v544_v4  ;;  %554 = vmatpush.bf16.msra.mxu1 %v544_v4 }
  0x3d   : > { %335 = vmatpush.bf16.msra.mxu0 %v543_v5  ;;  %555 = vmatpush.bf16.msra.mxu1 %v543_v5 }
  0x41   : > { %336 = vmatpush.bf16.msra.mxu0 %v542_v6  ;;  %556 = vmatpush.bf16.msra.mxu1 %v542_v6 }
  0x45   : > { %337 = vmatpush.bf16.msra.mxu0 %v541_v7  ;;  %557 = vmatpush.bf16.msra.mxu1 %v541_v7 }
  0x48   : > { %338 = vmatmul.bf16.vlgmr.msra.gmra.mxu0 %v539_v8  ;;  %343 = vmatmul.bf16.vlgmr.msra.gmra.mxu1 %v540_v9 }
  0xc5   : > { %v339_v12 = vpop.f32.mrf.mxu0  ;;  %v344_v13 = vpop.f32.mrf.mxu1 }
  0xc6   : > { %v340_v14 = vadd.f32 %v339_v12, %v266_v10  ;;  %v345_v15 = vadd.f32 %v344_v13, %v268_v11 }
  0xc8   : > { %349 = vst [vmem:[%s241_s26] sm:$0xff] %v340_v14 }
  0xc9   : > { %351 = vst [vmem:[%s241_s26 + $0x10] sm:$0xff] %v345_v15 }
  0xcd   : > { %v341_v18 = vpop.f32.mrf.mxu0  ;;  %v346_v19 = vpop.f32.mrf.mxu1 }
  0xce   : > { %v342_v20 = vadd.f32 %v341_v18, %v267_v16  ;;  %v347_v21 = vadd.f32 %v346_v19, %v269_v17 }
  0xd0   : > { %350 = vst [vmem:[%s241_s26 + $0x8] sm:$0xff] %v342_v20 }
  0xd1   : > { %352 = vst [vmem:[%s241_s26 + $0x18] sm:$0xff] %v347_v21 }
  0xd2   : > { %764 = shalt.err (!%p761_p0)
}
  0xd3   : > { %s831_s19 = smov 128   ;;  %s832_s18 = smov 8  }
  0xd4   : > { %568 = dma.vmem_to_hbm [thread:$0]  (%p932_p2), %s369_s29, 512, %s371_s30, %s354_s15, %s831_s19, %s831_s19, %s832_s18  }
  0xd5 PF: > { %s385_s20 = sand.u32 1, %s803_s12   ;;  %p582_p4 = pnand %p484_p10, %p900_p5 }
  0xd6   : > { %s386_s21 = scalar_lea.sflag [#allocation4], %s385_s20 }
  0xd7   : > { %p583_p6 = pneg %p582_p4 }
  0xd9   : > { %798 = dma.done.wait (%p583_p6), %s386_s21, 512  }
  0xda   : > { %800 = vsyncadd (%p583_p6), %s386_s21, 4294966784  ;;  %s20_s17 = sadd.s32 1, %s823_s17   ;;  %s1015_s12 = smov %s807_s13 }
  0xdb   : > { %p17_p8 = scmp.ge.s32.totalorder %s20_s17, 4   ;;  %s1016_s13 = smov %s811_s14 }
  0xdc   : > { %s1017_s14 = smov %s942_s28  ;;  %s1018_s15 = smov %s819_s16 }
  0xdd   : > { %s1019_s16 = smov %s1021_s11  ;;  %19 = sbr.rel (!%p17_p8) target bundleno = 7 (0x7), region = 86 }
  0xe2   :  { %392 = vsyncpa [#allocation3], 1 }
  0xe3   :  { %394 = vsyncpa [#allocation3 + $0x1], 1 }
  0xe4   :  { %395 = vsyncpa [#allocation6], 1 }
  0xe5   :  { %396 = vsyncpa [#allocation4], 1 }
  0xe6   :  { %398 = vsyncpa [#allocation4 + $0x1], 1 }

</bundles_post_ra>
